<compile_context>
chip_gen: v6e
topology: v6e:2x2x1
jax: 0.10.0
libtpu: 0.0.40
codegen_flags: <defaults>
</compile_context>

<pallas_src>
import functools

import jax
import jax.numpy as jnp
from jax.experimental import pallas as pl
from jax.experimental.pallas import tpu as pltpu


def _group_mean(y, bmean, num_models, num_classes, out_dtype):
    """Mean over the member groups packed along the lane axis of y (B, M*NC)."""
    s = y[:, 0:num_classes]
    for m in range(1, num_models):                       # static, tiny M
        s = s + y[:, m * num_classes:(m + 1) * num_classes]
    inv_m = 1.0 / float(num_models)                      # static Python constant
    return (s * inv_m + bmean).astype(out_dtype)


def _ensemble_kernel_single(x_ref, w_ref, bmean_ref, o_ref, *,
                            num_models, num_classes):
    """Single grid step: whole feature axis in one block, no scratch needed.

    x_ref    : (B, F)       activations
    w_ref    : (F, M*NC)    all member weights, model axis packed into lanes
    bmean_ref: (1, NC)      mean bias over members (f32)
    o_ref    : (B, NC)      ensemble-mean prediction
    """
    y = jnp.dot(x_ref[...], w_ref[...], preferred_element_type=jnp.float32)
    o_ref[...] = _group_mean(y, bmean_ref[...], num_models, num_classes,
                             o_ref.dtype)


def _ensemble_kernel_tiled(x_ref, w_ref, bmean_ref, o_ref, acc_ref, *,
                           num_models, num_classes):
    """Grid axis 0 tiles the flattened feature (reduction) axis.

    acc_ref : (B, M*NC) f32 lane-packed accumulator, persists across k steps.
    """
    k = pl.program_id(0)

    @pl.when(k == 0)
    def _():
        acc_ref[...] = jnp.zeros_like(acc_ref)

    # One MXU matmul yields every member's partial logits at once.
    acc_ref[...] += jnp.dot(x_ref[...], w_ref[...],
                            preferred_element_type=jnp.float32)

    @pl.when(k == pl.num_programs(0) - 1)
    def _():
        o_ref[...] = _group_mean(acc_ref[...], bmean_ref[...],
                                 num_models, num_classes, o_ref.dtype)


def ensemble_forward(x_nchw, weights, biases, *, use_bf16_matmul=False):
    """x_nchw: (B, C, H, W); weights: (M, F, NC); biases: (M, NC) -> (B, NC)."""
    B = x_nchw.shape[0]
    M, F, NC = weights.shape

    # Glue: flatten exactly like torch .view(B, -1).
    x_flat = x_nchw.reshape(B, F)
    # Pack the model axis into the lane dimension: W_all[:, m*NC:(m+1)*NC] == W_m.
    w_all = jnp.transpose(weights, (1, 0, 2)).reshape(F, M * NC)
    # Fold the bias mean once (exact for linear members).
    b_mean = jnp.mean(biases.astype(jnp.float32), axis=0).reshape(1, NC)

    if use_bf16_matmul:
        # Production-size option for v6e/v7x: bf16 MXU operands, f32 accumulate.
        x_flat = x_flat.astype(jnp.bfloat16)
        w_all = w_all.astype(jnp.bfloat16)

    # Feature-axis tiling: one block at small F; tile at large F so the
    # double-buffered (B, tk) + (tk, M*NC) blocks stay within VMEM (v7x: 64 MiB).
    if F > 4096 and F % 2048 == 0:
        tk = 2048
    else:
        tk = F
    grid_k = F // tk

    out_shape = jax.ShapeDtypeStruct((B, NC), x_nchw.dtype)

    if grid_k == 1:
        kernel = functools.partial(_ensemble_kernel_single,
                                   num_models=M, num_classes=NC)
        out = pl.pallas_call(
            kernel,
            out_shape=out_shape,
            grid_spec=pltpu.PrefetchScalarGridSpec(
                num_scalar_prefetch=0,
                grid=(1,),
                in_specs=[
                    pl.BlockSpec((B, F), lambda k: (0, 0)),         # activations
                    pl.BlockSpec((F, M * NC), lambda k: (0, 0)),    # packed weights
                    pl.BlockSpec((1, NC), lambda k: (0, 0)),        # mean bias
                ],
                out_specs=pl.BlockSpec((B, NC), lambda k: (0, 0)),
            ),
            compiler_params=pltpu.CompilerParams(
                dimension_semantics=("arbitrary",),
            ),
        )(x_flat, w_all, b_mean)
        return out

    kernel = functools.partial(_ensemble_kernel_tiled,
                               num_models=M, num_classes=NC)
    out = pl.pallas_call(
        kernel,
        out_shape=out_shape,
        grid_spec=pltpu.PrefetchScalarGridSpec(
            num_scalar_prefetch=0,
            grid=(grid_k,),
            in_specs=[
                pl.BlockSpec((B, tk), lambda k: (0, k)),            # activation tile
                pl.BlockSpec((tk, M * NC), lambda k: (k, 0)),       # packed weight tile
                pl.BlockSpec((1, NC), lambda k: (0, 0)),            # mean bias
            ],
            out_specs=pl.BlockSpec((B, NC), lambda k: (0, 0)),
            scratch_shapes=[pltpu.VMEM((B, M * NC), jnp.float32)],
        ),
        compiler_params=pltpu.CompilerParams(
            dimension_semantics=("arbitrary",),   # K is a reduction axis
        ),
    )(x_flat, w_all, b_mean)
    return out


def reference_forward(x_nchw, weights, biases):
    """Pure-JAX reference mirroring the PyTorch ensemble semantics."""
    B = x_nchw.shape[0]
    M, F, NC = weights.shape
    x_flat = x_nchw.reshape(B, F)
    preds = jnp.stack([x_flat @ weights[m] + biases[m] for m in range(M)], axis=0)
    return jnp.mean(preds, axis=0)


if __name__ == "__main__":
    # Small shapes consistent with the module's forward (NCHW image input).
    B, C, H, W = 2, 4, 16, 16
    NUM_MODELS = 3
    NUM_CLASSES = 2          # deepfake detection: {real, fake}
    F = C * H * W            # 1024 flattened features

    key = jax.random.PRNGKey(0)
    kx, kw, kb = jax.random.split(key, 3)

    x = jax.random.normal(kx, (B, C, H, W), dtype=jnp.float32)
    # Deterministic synthetic ensemble parameters (stand-in for model_list).
    # TODO(synk): arbitrary nn.Module members have no generic Pallas equivalent;
    # linear prediction heads are used as the member models.
    weights = jax.random.normal(kw, (NUM_MODELS, F, NUM_CLASSES), dtype=jnp.float32) * 0.02
    biases = jax.random.normal(kb, (NUM_MODELS, NUM_CLASSES), dtype=jnp.float32) * 0.1

    out = ensemble_forward(x, weights, biases)
    out = jax.block_until_ready(out)

    ref = reference_forward(x, weights, biases)
    assert out.shape == (B, NUM_CLASSES)
    assert jnp.allclose(out, ref, atol=1e-4, rtol=1e-4), "mismatch vs reference"

    print("KERNEL_OK")
</pallas_src>

<mosaic_0001>
module attributes {stable_mosaic.version = 11 : i64} {
  func.func @_ensemble_kernel_single(%arg0: i32, %arg1: memref<2x1024xf32, #tpu.memory_space<vmem>>, %arg2: memref<1024x6xf32, #tpu.memory_space<vmem>>, %arg3: memref<1x2xf32, #tpu.memory_space<vmem>>, %arg4: memref<2x2xf32, #tpu.memory_space<vmem>>) attributes {dimension_semantics = [#tpu.dimension_semantics<arbitrary>], iteration_bounds = array<i64: 1>, scalar_prefetch = 0 : i64, scratch_operands = 0 : i64, tpu.core_type = #tpu.core_type<tc>, window_params = [{pipeline_mode = #tpu.pipeline_mode<synchronous>, transform_indices = @transform_0, window_bounds = array<i64: 2, 1024>}, {pipeline_mode = #tpu.pipeline_mode<synchronous>, transform_indices = @transform_1, window_bounds = array<i64: 1024, 6>}, {pipeline_mode = #tpu.pipeline_mode<synchronous>, transform_indices = @transform_2, window_bounds = array<i64: 1, 2>}, {pipeline_mode = #tpu.pipeline_mode<synchronous>, transform_indices = @transform_3, window_bounds = array<i64: 2, 2>}]} {
    %c0 = arith.constant 0 : index
    %c0_0 = arith.constant 0 : index
    %0 = vector.load %arg1[%c0, %c0_0] : memref<2x1024xf32, #tpu.memory_space<vmem>>, vector<2x1024xf32>
    %c0_1 = arith.constant 0 : index
    %c0_2 = arith.constant 0 : index
    %1 = vector.load %arg2[%c0_1, %c0_2] : memref<1024x6xf32, #tpu.memory_space<vmem>>, vector<1024x6xf32>
    %cst = arith.constant dense<0.000000e+00> : vector<2x6xf32>
    %2 = tpu.matmul %0, %1, %cst {dimension_numbers = #tpu.dot_dimension_numbers<[1], [0], [0], [1], [0, 0, 1, 1], [], []>} : vector<2x1024xf32>, vector<1024x6xf32>, vector<2x6xf32> -> vector<2x6xf32>
    %c0_3 = arith.constant 0 : index
    %c0_4 = arith.constant 0 : index
    %3 = vector.load %arg3[%c0_3, %c0_4] : memref<1x2xf32, #tpu.memory_space<vmem>>, vector<1x2xf32>
    %4 = vector.extract_strided_slice %2 {offsets = [0, 0], sizes = [2, 2], strides = [1, 1]} : vector<2x6xf32> to vector<2x2xf32>
    %5 = vector.extract_strided_slice %2 {offsets = [0, 2], sizes = [2, 2], strides = [1, 1]} : vector<2x6xf32> to vector<2x2xf32>
    %6 = arith.addf %4, %5 : vector<2x2xf32>
    %7 = vector.extract_strided_slice %2 {offsets = [0, 4], sizes = [2, 2], strides = [1, 1]} : vector<2x6xf32> to vector<2x2xf32>
    %8 = arith.addf %6, %7 : vector<2x2xf32>
    %cst_5 = arith.constant 0.333333343 : f32
    %9 = vector.broadcast %cst_5 : f32 to vector<2x2xf32>
    %10 = arith.mulf %8, %9 : vector<2x2xf32>
    %11 = vector.broadcast %3 : vector<1x2xf32> to vector<2x2xf32>
    %12 = arith.addf %10, %11 : vector<2x2xf32>
    %c0_6 = arith.constant 0 : index
    %c0_7 = arith.constant 0 : index
    %13 = vector.load %arg4[%c0_6, %c0_7] : memref<2x2xf32, #tpu.memory_space<vmem>>, vector<2x2xf32>
    tpu.vector_store %arg4[%c0_6, %c0_7], %12 {strides = array<i32>} : memref<2x2xf32, #tpu.memory_space<vmem>>, vector<2x2xf32>,
    return
  }
  func.func @transform_0(%arg0: i32) -> (i32, i32) {
    %c0_i32 = arith.constant 0 : i32
    %c0_i32_0 = arith.constant 0 : i32
    %c0_i32_1 = arith.constant 0 : i32
    return %c0_i32, %c0_i32_0 : i32, i32
  }
  func.func @transform_1(%arg0: i32) -> (i32, i32) {
    %c0_i32 = arith.constant 0 : i32
    %c0_i32_0 = arith.constant 0 : i32
    %c0_i32_1 = arith.constant 0 : i32
    return %c0_i32, %c0_i32_0 : i32, i32
  }
  func.func @transform_2(%arg0: i32) -> (i32, i32) {
    %c0_i32 = arith.constant 0 : i32
    %c0_i32_0 = arith.constant 0 : i32
    %c0_i32_1 = arith.constant 0 : i32
    return %c0_i32, %c0_i32_0 : i32, i32
  }
  func.func @transform_3(%arg0: i32) -> (i32, i32) {
    %c0_i32 = arith.constant 0 : i32
    %c0_i32_0 = arith.constant 0 : i32
    %c0_i32_1 = arith.constant 0 : i32
    return %c0_i32, %c0_i32_0 : i32, i32
  }
}

</mosaic_0001>

<bundles_post_ra>
// kernel: tpu_custom_call.1
= control target key start
LH: loop header
LB: loop body
LE: loop exit
PB: predicated region body
PF: predicated region fallthrough
CT: control target
= control target key end

     0   :  { %v672_v30 = vmov 1983009808   ;;  %v151_v32 = vlaneseq  ;;  %s1098_s0 = inlined_call_operand.vmem [shape: f32[2,1024], index: 0, kind: input, shape index: {}]   ;;  %s1099_s1 = inlined_call_operand.vmem [shape: f32[1024,6], index: 1, kind: input, shape index: {}]   ;;  %s1100_s2 = inlined_call_operand.vmem [shape: f32[1,2], index: 2, kind: input, shape index: {}]   ;;  %s1101_s3 = inlined_call_operand.hbm [shape: f32[2,2], index: 3, kind: output, shape index: {}]  }
   0x1   :  { %v48_v0 = vld [vmem:[%s1099_s1 + $0xf8] sm:$0xff]  ;;  %v47_v4 = vld [vmem:[%s1099_s1 + $0xf0] sm:$0xff]  ;;  %v46_v8 = vld [vmem:[%s1099_s1 + $0xe8] sm:$0xff]  ;;  %v149_v31 = vunpack.c.l.s4 %v672_v30 }
   0x2   :  { %v80_v1 = vld [vmem:[%s1099_s1 + $0x1f8] sm:$0xff]  ;;  %504 = vmatprep.subr.mxu0 %v48_v0  ;;  %v79_v5 = vld [vmem:[%s1099_s1 + $0x1f0] sm:$0xff]  ;;  %v78_v9 = vld [vmem:[%s1099_s1 + $0x1e8] sm:$0xff]  ;;  %v152_v42 = vshrl.u32 %v151_v32, 7 }
   0x3   :  { %v32_v2 = vld [vmem:[%s1099_s1 + $0x78] sm:$0xff]  ;;  %539 = vmatprep.subr.mxu1 %v80_v1  ;;  %v31_v6 = vld [vmem:[%s1099_s1 + $0x70] sm:$0xff]  ;;  %v30_v10 = vld [vmem:[%s1099_s1 + $0x68] sm:$0xff]  ;;  %v150_v41 = vunpack.c.0.s8 %v149_v31 }
   0x4   :  { %v64_v3 = vld [vmem:[%s1099_s1 + $0x178] sm:$0xff]  ;;  %505 = vmatpush3.msra.mxu0 %v32_v2  ;;  %v63_v7 = vld [vmem:[%s1099_s1 + $0x170] sm:$0xff]  ;;  %v62_v11 = vld [vmem:[%s1099_s1 + $0x168] sm:$0xff] }
   0x5   :  { %540 = vmatpush3.msra.mxu1 %v64_v3  ;;  %506 = vmatprep.subr.mxu0 %v47_v4  ;;  %v45_v12 = vld [vmem:[%s1099_s1 + $0xe0] sm:$0xff]  ;;  %v44_v16 = vld [vmem:[%s1099_s1 + $0xd8] sm:$0xff]  ;;  %v43_v20 = vld [vmem:[%s1099_s1 + $0xd0] sm:$0xff]  ;;  %v834_v51 = vsub.s32 %v150_v41, %v152_v42 }
   0x6   :  { %541 = vmatprep.subr.mxu1 %v79_v5  ;;  %507 = vmatpush3.msra.mxu0 %v31_v6  ;;  %v77_v13 = vld [vmem:[%s1099_s1 + $0x1e0] sm:$0xff]  ;;  %v76_v17 = vld [vmem:[%s1099_s1 + $0x1d8] sm:$0xff]  ;;  %v75_v21 = vld [vmem:[%s1099_s1 + $0x1d0] sm:$0xff] }
   0x7   :  { %542 = vmatpush3.msra.mxu1 %v63_v7  ;;  %508 = vmatprep.subr.mxu0 %v46_v8  ;;  %v29_v14 = vld [vmem:[%s1099_s1 + $0x60] sm:$0xff]  ;;  %v28_v18 = vld [vmem:[%s1099_s1 + $0x58] sm:$0xff]  ;;  %v27_v22 = vld [vmem:[%s1099_s1 + $0x50] sm:$0xff] }
   0x8   :  { %543 = vmatprep.subr.mxu1 %v78_v9  ;;  %v61_v15 = vld [vmem:[%s1099_s1 + $0x160] sm:$0xff]  ;;  %509 = vmatpush3.msra.mxu0 %v30_v10  ;;  %v60_v19 = vld [vmem:[%s1099_s1 + $0x158] sm:$0xff]  ;;  %v59_v23 = vld [vmem:[%s1099_s1 + $0x150] sm:$0xff] }
   0x9   :  { %544 = vmatpush3.msra.mxu1 %v62_v11  ;;  %510 = vmatprep.subr.mxu0 %v45_v12  ;;  %v42_v24 = vld [vmem:[%s1099_s1 + $0xc8] sm:$0xff]  ;;  %v41_v28 = vld [vmem:[%s1099_s1 + $0xc0] sm:$0xff]  ;;  %v40_v35 = vld [vmem:[%s1099_s1 + $0xb8] sm:$0xff] }
   0xa   :  { %545 = vmatprep.subr.mxu1 %v77_v13  ;;  %511 = vmatpush3.msra.mxu0 %v29_v14  ;;  %v74_v25 = vld [vmem:[%s1099_s1 + $0x1c8] sm:$0xff]  ;;  %v73_v29 = vld [vmem:[%s1099_s1 + $0x1c0] sm:$0xff]  ;;  %v72_v36 = vld [vmem:[%s1099_s1 + $0x1b8] sm:$0xff] }
   0xb   :  { %546 = vmatpush3.msra.mxu1 %v61_v15  ;;  %512 = vmatprep.subr.mxu0 %v44_v16  ;;  %v26_v26 = vld [vmem:[%s1099_s1 + $0x48] sm:$0xff]  ;;  %v25_v33 = vld [vmem:[%s1099_s1 + $0x40] sm:$0xff]  ;;  %v24_v37 = vld [vmem:[%s1099_s1 + $0x38] sm:$0xff] }
   0xc   :  { %547 = vmatprep.subr.mxu1 %v76_v17  ;;  %513 = vmatpush3.msra.mxu0 %v28_v18  ;;  %v58_v27 = vld [vmem:[%s1099_s1 + $0x148] sm:$0xff]  ;;  %v57_v34 = vld [vmem:[%s1099_s1 + $0x140] sm:$0xff]  ;;  %v56_v38 = vld [vmem:[%s1099_s1 + $0x138] sm:$0xff] }
   0xd   :  { %548 = vmatpush3.msra.mxu1 %v60_v19  ;;  %514 = vmatprep.subr.mxu0 %v43_v20  ;;  %v39_v39 = vld [vmem:[%s1099_s1 + $0xb0] sm:$0xff]  ;;  %v38_v45 = vld [vmem:[%s1099_s1 + $0xa8] sm:$0xff]  ;;  %v37_v49 = vld [vmem:[%s1099_s1 + $0xa0] sm:$0xff] }
   0xe   :  { %549 = vmatprep.subr.mxu1 %v75_v21  ;;  %515 = vmatpush3.msra.mxu0 %v27_v22  ;;  %v71_v40 = vld [vmem:[%s1099_s1 + $0x1b0] sm:$0xff]  ;;  %v70_v46 = vld [vmem:[%s1099_s1 + $0x1a8] sm:$0xff]  ;;  %v69_v50 = vld [vmem:[%s1099_s1 + $0x1a0] sm:$0xff] }
   0xf   :  { %550 = vmatpush3.msra.mxu1 %v59_v23  ;;  %516 = vmatprep.subr.mxu0 %v42_v24  ;;  %v23_v43 = vld [vmem:[%s1099_s1 + $0x30] sm:$0xff]  ;;  %v22_v47 = vld [vmem:[%s1099_s1 + $0x28] sm:$0xff]  ;;  %v21_v52 = vld [vmem:[%s1099_s1 + $0x20] sm:$0xff] }
  0x10   :  { %551 = vmatprep.subr.mxu1 %v74_v25  ;;  %517 = vmatpush3.msra.mxu0 %v26_v26  ;;  %v55_v44 = vld [vmem:[%s1099_s1 + $0x130] sm:$0xff]  ;;  %v54_v48 = vld [vmem:[%s1099_s1 + $0x128] sm:$0xff]  ;;  %v53_v53 = vld [vmem:[%s1099_s1 + $0x120] sm:$0xff] }
  0x11   :  { %552 = vmatpush3.msra.mxu1 %v58_v27  ;;  %518 = vmatprep.subr.mxu0 %v41_v28  ;;  %v15_v54 = vld [vmem:[%s1098_s0] sm:$0xff]  ;;  %v36_v55 = vld [vmem:[%s1099_s1 + $0x98] sm:$0xff]  ;;  %v35_v60 = vld [vmem:[%s1099_s1 + $0x90] sm:$0xff] }
  0x12   :  { %553 = vmatprep.subr.mxu1 %v73_v29  ;;  %519 = vmatpush3.msra.mxu0 %v25_v33  ;;  %v68_v56 = vld [vmem:[%s1099_s1 + $0x198] sm:$0xff]  ;;  %v147_v57 = vcombine.high %v15_v54, %v15_v54  ;;  %v67_v61 = vld [vmem:[%s1099_s1 + $0x190] sm:$0xff]  ;;  %v154_v62 = vrot.slane %v15_v54, %v834_v51  ;;  %v34_v2 = vld [vmem:[%s1099_s1 + $0x88] sm:$0xff] }
  0x13   :  { %554 = vmatpush3.msra.mxu1 %v57_v34  ;;  %520 = vmatprep.subr.mxu0 %v40_v35  ;;  %v20_v58 = vld [vmem:[%s1099_s1 + $0x18] sm:$0xff]  ;;  %v19_v63 = vld [vmem:[%s1099_s1 + $0x10] sm:$0xff]  ;;  %v66_v3 = vld [vmem:[%s1099_s1 + $0x188] sm:$0xff] }
  0x14   :  { %555 = vmatprep.subr.mxu1 %v72_v36  ;;  %521 = vmatpush3.msra.mxu0 %v24_v37  ;;  %v52_v59 = vld [vmem:[%s1099_s1 + $0x118] sm:$0xff]  ;;  %v51_v0 = vld [vmem:[%s1099_s1 + $0x110] sm:$0xff]  ;;  %v161_v1 = vrot.slane %v147_v57, %v834_v51  ;;  %v18_v4 = vld [vmem:[%s1099_s1 + $0x8] sm:$0xff]  ;;  %v162_v8 = vcombine.high %v154_v62, %v154_v62 }
  0x15   :  { %556 = vmatpush3.msra.mxu1 %v56_v38  ;;  %522 = vmatprep.subr.mxu0 %v39_v39  ;;  %v50_v5 = vld [vmem:[%s1099_s1 + $0x108] sm:$0xff]  ;;  %v33_v6 = vld [vmem:[%s1099_s1 + $0x80] sm:$0xff]  ;;  %v112_v12 = vld [vmem:[%s1099_s1 + $0x2f8] sm:$0xff] }
  0x16   :  { %557 = vmatprep.subr.mxu1 %v71_v40  ;;  %523 = vmatpush3.msra.mxu0 %v23_v43  ;;  %v65_v7 = vld [vmem:[%s1099_s1 + $0x180] sm:$0xff]  ;;  %v163_v10 = vcombine.high %v161_v1, %v161_v1  ;;  %v144_v13 = vld [vmem:[%s1099_s1 + $0x3f8] sm:$0xff]  ;;  %v111_v16 = vld [vmem:[%s1099_s1 + $0x2f0] sm:$0xff] }
  0x17   :  { %558 = vmatpush3.msra.mxu1 %v55_v44  ;;  %524 = vmatprep.subr.mxu0 %v38_v45  ;;  %v17_v9 = vld [vmem:[%s1099_s1] sm:$0xff]  ;;  %v96_v14 = vld [vmem:[%s1099_s1 + $0x278] sm:$0xff]  ;;  %v143_v17 = vld [vmem:[%s1099_s1 + $0x3f0] sm:$0xff] }
  0x18   :  { %559 = vmatprep.subr.mxu1 %v70_v46  ;;  %525 = vmatpush3.msra.mxu0 %v22_v47  ;;  %v49_v11 = vld [vmem:[%s1099_s1 + $0x100] sm:$0xff]  ;;  %v128_v15 = vld [vmem:[%s1099_s1 + $0x378] sm:$0xff]  ;;  %v95_v18 = vld [vmem:[%s1099_s1 + $0x270] sm:$0xff] }
  0x19   :  { %560 = vmatpush3.msra.mxu1 %v54_v48  ;;  %526 = vmatprep.subr.mxu0 %v37_v49  ;;  %v127_v19 = vld [vmem:[%s1099_s1 + $0x370] sm:$0xff]  ;;  %v110_v20 = vld [vmem:[%s1099_s1 + $0x2e8] sm:$0xff]  ;;  %v109_v24 = vld [vmem:[%s1099_s1 + $0x2e0] sm:$0xff] }
  0x1a   :  { %561 = vmatprep.subr.mxu1 %v69_v50  ;;  %527 = vmatpush3.msra.mxu0 %v21_v52  ;;  %v142_v21 = vld [vmem:[%s1099_s1 + $0x3e8] sm:$0xff]  ;;  %v141_v25 = vld [vmem:[%s1099_s1 + $0x3e0] sm:$0xff]  ;;  %v108_v28 = vld [vmem:[%s1099_s1 + $0x2d8] sm:$0xff] }
  0x1b   :  { %562 = vmatpush3.msra.mxu1 %v53_v53  ;;  %528 = vmatprep.subr.mxu0 %v36_v55  ;;  %v94_v22 = vld [vmem:[%s1099_s1 + $0x268] sm:$0xff]  ;;  %v93_v26 = vld [vmem:[%s1099_s1 + $0x260] sm:$0xff]  ;;  %v140_v29 = vld [vmem:[%s1099_s1 + $0x3d8] sm:$0xff] }
  0x1c   :  { %563 = vmatprep.subr.mxu1 %v68_v56  ;;  %529 = vmatpush3.msra.mxu0 %v20_v58  ;;  %v126_v23 = vld [vmem:[%s1099_s1 + $0x368] sm:$0xff]  ;;  %v125_v27 = vld [vmem:[%s1099_s1 + $0x360] sm:$0xff]  ;;  %v92_v30 = vld [vmem:[%s1099_s1 + $0x258] sm:$0xff] }
  0x1d   :  { %564 = vmatpush3.msra.mxu1 %v52_v59  ;;  %530 = vmatprep.subr.mxu0 %v35_v60  ;;  %v124_v31 = vld [vmem:[%s1099_s1 + $0x358] sm:$0xff]  ;;  %v107_v32 = vld [vmem:[%s1099_s1 + $0x2d0] sm:$0xff] }
  0x1e   :  { %565 = vmatprep.subr.mxu1 %v67_v61  ;;  %531 = vmatpush3.msra.mxu0 %v19_v63  ;;  %v139_v33 = vld [vmem:[%s1099_s1 + $0x3d0] sm:$0xff] }
  0x1f   :  { %566 = vmatpush3.msra.mxu1 %v51_v0  ;;  %532 = vmatprep.subr.mxu0 %v34_v2  ;;  %v91_v34 = vld [vmem:[%s1099_s1 + $0x250] sm:$0xff] }
  0x20   :  { %567 = vmatprep.subr.mxu1 %v66_v3  ;;  %533 = vmatpush3.msra.mxu0 %v18_v4  ;;  %v123_v35 = vld [vmem:[%s1099_s1 + $0x350] sm:$0xff] }
  0x21   :  { %568 = vmatpush3.msra.mxu1 %v50_v5  ;;  %534 = vmatprep.subr.mxu0 %v33_v6 }
  0x22   :  { %569 = vmatprep.subr.mxu1 %v65_v7  ;;  %535 = vmatpush3.msra.mxu0 %v17_v9 }
  0x23   :  { %253 = vmatprep.mubr.f32.mxu0 %v162_v8  ;;  %570 = vmatpush3.msra.mxu1 %v49_v11 }
  0x24   :  { %323 = vmatprep.mubr.f32.mxu1 %v163_v10  ;;  %254 = vmatmul.mubr.f32.vlgmr.msra.gmra.mxu0 %v154_v62 }
  0x25   :  { %324 = vmatmul.mubr.f32.vlgmr.msra.gmra.mxu1 %v161_v1  ;;  %574 = vmatprep.subr.mxu0 %v112_v12 }
  0x26   :  { %609 = vmatprep.subr.mxu1 %v144_v13  ;;  %575 = vmatpush3.msra.mxu0 %v96_v14 }
  0x27   :  { %610 = vmatpush3.msra.mxu1 %v128_v15  ;;  %576 = vmatprep.subr.mxu0 %v111_v16 }
  0x28   :  { %611 = vmatprep.subr.mxu1 %v143_v17  ;;  %577 = vmatpush3.msra.mxu0 %v95_v18 }
  0x29   :  { %612 = vmatpush3.msra.mxu1 %v127_v19  ;;  %578 = vmatprep.subr.mxu0 %v110_v20 }
  0x2a   :  { %613 = vmatprep.subr.mxu1 %v142_v21  ;;  %579 = vmatpush3.msra.mxu0 %v94_v22 }
  0x2b   :  { %614 = vmatpush3.msra.mxu1 %v126_v23  ;;  %580 = vmatprep.subr.mxu0 %v109_v24 }
  0x2c   :  { %615 = vmatprep.subr.mxu1 %v141_v25  ;;  %581 = vmatpush3.msra.mxu0 %v93_v26 }
  0x2d   :  { %616 = vmatpush3.msra.mxu1 %v125_v27  ;;  %582 = vmatprep.subr.mxu0 %v108_v28 }
  0x2e   :  { %617 = vmatprep.subr.mxu1 %v140_v29 }
  0x2f   :  { %8 = vsyncpa [#allocation3], 0  ;;  %583 = vmatpush3.msra.mxu0 %v92_v30  ;;  %618 = vmatpush3.msra.mxu1 %v124_v31  ;;  %v106_v36 = vld [vmem:[%s1099_s1 + $0x2c8] sm:$0xff]  ;;  %v105_v40 = vld [vmem:[%s1099_s1 + $0x2c0] sm:$0xff]  ;;  %s674_s27 = smov 124   ;;  %s675_s30 = smov [#allocation2]  }
  0x30   :  { %v138_v37 = vld [vmem:[%s1099_s1 + $0x3c8] sm:$0xff]  ;;  %584 = vmatprep.subr.mxu0 %v107_v32  ;;  %619 = vmatprep.subr.mxu1 %v139_v33  ;;  %v137_v41 = vld [vmem:[%s1099_s1 + $0x3c0] sm:$0xff]  ;;  %v104_v44 = vld [vmem:[%s1099_s1 + $0x2b8] sm:$0xff]  ;;  %s495_s4 = sshll.u32 %s675_s30, 4  ;;  %vm487_vm0 = vcmask 9216   ;;  %s496_s4 = int_to_ptr.vmem [resolvable:$true] %s495_s4 }
  0x31   :  { %v90_v38 = vld [vmem:[%s1099_s1 + $0x248] sm:$0xff]  ;;  %585 = vmatpush3.msra.mxu0 %v91_v34  ;;  %620 = vmatpush3.msra.mxu1 %v123_v35  ;;  %v89_v42 = vld [vmem:[%s1099_s1 + $0x240] sm:$0xff]  ;;  %v136_v45 = vld [vmem:[%s1099_s1 + $0x3b8] sm:$0xff]  ;;  %s650_s5 = scalar_lea.vmem %s496_s4, 32  ;;  %p655_p1 = scmp.lt.s32.totalorder %s496_s4, %s496_s4 }
  0x32   :  { %v122_v39 = vld [vmem:[%s1099_s1 + $0x348] sm:$0xff]  ;;  %586 = vmatprep.subr.mxu0 %v106_v36  ;;  %621 = vmatprep.subr.mxu1 %v138_v37  ;;  %v121_v43 = vld [vmem:[%s1099_s1 + $0x340] sm:$0xff]  ;;  %v88_v46 = vld [vmem:[%s1099_s1 + $0x238] sm:$0xff]  ;;  %p651_p0 = scmp.ne.s32.totalorder %s496_s4, %s650_s5  ;;  %p656_p2 = scmp.lt.s32.totalorder %s650_s5, %s650_s5 }
  0x33   :  { %587 = vmatpush3.msra.mxu0 %v90_v38  ;;  %622 = vmatpush3.msra.mxu1 %v122_v39  ;;  %v120_v47 = vld [vmem:[%s1099_s1 + $0x338] sm:$0xff]  ;;  %v103_v48 = vld [vmem:[%s1099_s1 + $0x2b0] sm:$0xff]  ;;  %v102_v53 = vld [vmem:[%s1099_s1 + $0x2a8] sm:$0xff] }
  0x34   :  { %588 = vmatprep.subr.mxu0 %v105_v40  ;;  %623 = vmatprep.subr.mxu1 %v137_v41  ;;  %v135_v49 = vld [vmem:[%s1099_s1 + $0x3b0] sm:$0xff]  ;;  %v134_v54 = vld [vmem:[%s1099_s1 + $0x3a8] sm:$0xff]  ;;  %v101_v58 = vld [vmem:[%s1099_s1 + $0x2a0] sm:$0xff]  ;;  %p657_p3 = por %p656_p2, %p655_p1 }
  0x35   :  { %589 = vmatpush3.msra.mxu0 %v89_v42  ;;  %624 = vmatpush3.msra.mxu1 %v121_v43  ;;  %v87_v50 = vld [vmem:[%s1099_s1 + $0x230] sm:$0xff]  ;;  %v16_v55 = vld [vmem:[%s1098_s0 + $0x8] sm:$0xff]  ;;  %v133_v59 = vld [vmem:[%s1099_s1 + $0x3a0] sm:$0xff] }
  0x36   :  { %590 = vmatprep.subr.mxu0 %v104_v44  ;;  %625 = vmatprep.subr.mxu1 %v136_v45  ;;  %v119_v52 = vld [vmem:[%s1099_s1 + $0x330] sm:$0xff]  ;;  %v86_v56 = vld [vmem:[%s1099_s1 + $0x228] sm:$0xff]  ;;  %v85_v60 = vld [vmem:[%s1099_s1 + $0x220] sm:$0xff]  ;;  %v164_v62 = vcombine.high %v16_v55, %v16_v55  ;;  %v171_v5 = vrot.slane %v16_v55, %v834_v51  ;;  %p658_p4 = pnand %p657_p3, %p651_p0 }
  0x37   :  { %591 = vmatpush3.msra.mxu0 %v88_v46  ;;  %626 = vmatpush3.msra.mxu1 %v120_v47  ;;  %v118_v57 = vld [vmem:[%s1099_s1 + $0x328] sm:$0xff]  ;;  %v117_v61 = vld [vmem:[%s1099_s1 + $0x320] sm:$0xff]  ;;  %v100_v63 = vld [vmem:[%s1099_s1 + $0x298] sm:$0xff] }
  0x38   :  { %592 = vmatprep.subr.mxu0 %v103_v48  ;;  %627 = vmatprep.subr.mxu1 %v135_v49  ;;  %v132_v0 = vld [vmem:[%s1099_s1 + $0x398] sm:$0xff]  ;;  %v99_v3 = vld [vmem:[%s1099_s1 + $0x290] sm:$0xff]  ;;  %v178_v8 = vrot.slane %v164_v62, %v834_v51  ;;  %v98_v9 = vld [vmem:[%s1099_s1 + $0x288] sm:$0xff]  ;;  %v179_v14 = vcombine.high %v171_v5, %v171_v5 }
  0x39   :  { %593 = vmatpush3.msra.mxu0 %v87_v50  ;;  %628 = vmatpush3.msra.mxu1 %v119_v52  ;;  %v84_v1 = vld [vmem:[%s1099_s1 + $0x218] sm:$0xff]  ;;  %v131_v4 = vld [vmem:[%s1099_s1 + $0x390] sm:$0xff]  ;;  %v130_v10 = vld [vmem:[%s1099_s1 + $0x388] sm:$0xff] }
  0x3a   :  { %594 = vmatprep.subr.mxu0 %v102_v53  ;;  %629 = vmatprep.subr.mxu1 %v134_v54  ;;  %v116_v2 = vld [vmem:[%s1099_s1 + $0x318] sm:$0xff]  ;;  %v83_v6 = vld [vmem:[%s1099_s1 + $0x210] sm:$0xff]  ;;  %v82_v11 = vld [vmem:[%s1099_s1 + $0x208] sm:$0xff]  ;;  %v180_v16 = vcombine.high %v178_v8, %v178_v8 }
  0x3b   :  { %595 = vmatpush3.msra.mxu0 %v86_v56  ;;  %630 = vmatpush3.msra.mxu1 %v118_v57  ;;  %v115_v7 = vld [vmem:[%s1099_s1 + $0x310] sm:$0xff]  ;;  %v114_v51 = vld [vmem:[%s1099_s1 + $0x308] sm:$0xff]  ;;  %v97_v12 = vld [vmem:[%s1099_s1 + $0x280] sm:$0xff] }
  0x3c   :  { %596 = vmatprep.subr.mxu0 %v101_v58  ;;  %631 = vmatprep.subr.mxu1 %v133_v59  ;;  %v129_v13 = vld [vmem:[%s1099_s1 + $0x380] sm:$0xff] }
  0x3d   :  { %597 = vmatpush3.msra.mxu0 %v85_v60  ;;  %632 = vmatpush3.msra.mxu1 %v117_v61  ;;  %v81_v15 = vld [vmem:[%s1099_s1 + $0x200] sm:$0xff] }
  0x3e   :  { %598 = vmatprep.subr.mxu0 %v100_v63  ;;  %633 = vmatprep.subr.mxu1 %v132_v0  ;;  %v113_v17 = vld [vmem:[%s1099_s1 + $0x300] sm:$0xff]  ;;  %s673_s1 = smov 126  }
  0x3f   :  { %599 = vmatpush3.msra.mxu0 %v84_v1  ;;  %634 = vmatpush3.msra.mxu1 %v116_v2  ;;  %v503_v37 = vld [vmem:[%s1100_s2] ss:$0 sm:$0xff] }
  0x40   :  { %600 = vmatprep.subr.mxu0 %v99_v3  ;;  %635 = vmatprep.subr.mxu1 %v131_v4 }
  0x41   :  { %601 = vmatpush3.msra.mxu0 %v83_v6  ;;  %636 = vmatpush3.msra.mxu1 %v115_v7 }
  0x42   :  { %602 = vmatprep.subr.mxu0 %v98_v9  ;;  %637 = vmatprep.subr.mxu1 %v130_v10 }
  0x43   :  { %603 = vmatpush3.msra.mxu0 %v82_v11  ;;  %638 = vmatpush3.msra.mxu1 %v114_v51 }
  0x44   :  { %604 = vmatprep.subr.mxu0 %v97_v12  ;;  %639 = vmatprep.subr.mxu1 %v129_v13 }
  0x45   :  { %605 = vmatpush3.msra.mxu0 %v81_v15  ;;  %393 = vmatprep.mubr.f32.mxu0 %v179_v14 }
  0x46   :  { %640 = vmatpush3.msra.mxu1 %v113_v17  ;;  %463 = vmatprep.mubr.f32.mxu1 %v180_v16 }
  0x47   :  { %394 = vmatmul.mubr.f32.vlgmr.msra.gmra.mxu0 %v171_v5  ;;  %464 = vmatmul.mubr.f32.vlgmr.msra.gmra.mxu1 %v178_v8 }
  0xe4   :  { %v536_v18 = vpop.f32.mrf.mxu0 }
  0xe5   :  { %v571_v19 = vpop.f32.mrf.mxu1 }
  0xe6   :  { %v537_v20 = vpop.f32.mrf.mxu0 }
  0xe7   :  { %v572_v21 = vpop.f32.mrf.mxu1  ;;  %v538_v22 = vadd.f32 %v537_v20, %v536_v18 }
  0xe8   :  { %v573_v23 = vadd.f32 %v572_v21, %v571_v19 }
  0xea   :  { %v326_v28 = vadd.f32 %v573_v23, %v538_v22 }
 0x107   :  { %v606_v24 = vpop.f32.mrf.mxu0  ;;  %v641_v25 = vpop.f32.mrf.mxu1 }
 0x109   :  { %v607_v26 = vpop.f32.mrf.mxu0  ;;  %v642_v27 = vpop.f32.mrf.mxu1 }
 0x10a   :  { %v608_v29 = vadd.f32 %v607_v26, %v606_v24  ;;  %v643_v31 = vadd.f32 %v642_v27, %v641_v25 }
 0x10c   :  { %v396_v30 = vadd.f32 %v608_v29, %v326_v28 }
 0x10e   :  { %v466_v32 = vadd.f32 %v643_v31, %v396_v30 }
 0x110   :  { %471 = vrot.lane.b32.xlu0 %v466_v32, %s673_s1 }
 0x114   :  { %475 = vrot.lane.b32.xlu0 %v466_v32, %s674_s27 }
 0x182   :  { %v472_v33 = vpop.permute.xlu0 %471 }
 0x183   :  { %v474_v34 = vadd.f32 %v472_v33, %v466_v32 }
 0x186   :  { %v476_v35 = vpop.permute.xlu0 %475 }
 0x187   :  { %v478_v36 = vadd.f32 %v476_v35, %v474_v34 }
 0x189   :  { %v479_v38 = vmul.f32 0.33333334, %v478_v36 }
 0x18b   :  { %v486_v39 = vadd.f32 %v503_v37, %v479_v38 }
 0x18d   :  { %488 = vst.msk [vmem:[#allocation2] sm:$0x3] %vm487_vm0, %v486_v39 }
 0x18e   :  { %661 = shalt.err (!%p658_p4)
}
 0x18f   :  { %498 = dma.vmem_to_hbm [thread:$0]  %s496_s4, 32, %s1101_s3, [#allocation3]  }
 0x190   :  { %670 = dma.done.wait [#allocation3], 32  }
 0x191   :  { %671 = vsyncadd [#allocation3], 4294967264 }
 0x192   :  { %502 = vsyncpa [#allocation3], 1 }

</bundles_post_ra>
